<compile_context>
chip_gen: v5e
topology: v5e:2x2
jax: 0.10.0
libtpu: 0.0.40
codegen_flags: <defaults>
</compile_context>

<pallas_src>
import jax
import jax.numpy as jnp
from jax import lax
from jax.experimental import pallas as pl
from jax.experimental.pallas import tpu as pltpu


def _round_up(x, m):
    return ((x + m - 1) // m) * m


def gru_predictor_kernel(x_ref, wih_ref, whh_ref, bx_ref, bhn_ref,
                         wout_ref, bout_ref,
                         y_ref,
                         gx_ref, hs_ref):
    """Single-invocation GRU + per-step Linear/Sigmoid head.

    x_ref:    (T*BP, F)      time-major input, flattened (row = t*BP + b)
    wih_ref:  (F, G)         input->gates, 3 gates packed into one 128-lane tile
    whh_ref:  (H, G)         hidden->gates, gates packed (lanes 3H:G are zero)
    bx_ref:   (1, G)         b_ih (+ b_hh for r,z gates), pre-combined
    bhn_ref:  (1, H)         b_hh of the n-gate (stays inside the recurrence)
    wout_ref: (H, NP)        output head weight (real weight in column 0)
    bout_ref: (1, NP)        output head bias (broadcast)
    y_ref:    (T*BP, NP)     sigmoid(logits); column 0 is the real output
    gx_ref:   (T, BP, G)     scratch: hoisted input projection
    hs_ref:   (T, BP, H)     scratch: hidden-state sequence
    """
    T, BP, G = gx_ref.shape
    H = hs_ref.shape[-1]

    # ---- Hoisted input projection: one matmul for all T timesteps. ----
    gx_all = jnp.dot(x_ref[...], wih_ref[...],
                     preferred_element_type=jnp.float32) + bx_ref[...]
    gx_ref[...] = gx_all.reshape(T, BP, G)

    # whh is tiny after gate packing (H x G = 32x128 f32 = 4 vregs): safe to
    # keep resident across the unrolled recurrence.
    whh = whh_ref[...]
    # Hoist the (1,H)->(BP,H) broadcast out of the unrolled loop.
    bhn_b = jnp.broadcast_to(bhn_ref[...], (BP, H))

    def step(t, h):                                   # h: (BP, H) in vregs
        gx = gx_ref[t]                                # (BP, G)
        gh = jnp.dot(h, whh,
                     preferred_element_type=jnp.float32)   # single MXU pass
        a = gx + gh                                   # r,z pre-activations
        rz = jax.nn.sigmoid(a[:, 0:2 * H])            # fused r+z: 1 EUP op
        r = rz[:, 0:H]
        z = rz[:, H:2 * H]
        n = jnp.tanh(gx[:, 2 * H:3 * H] + r * (gh[:, 2 * H:3 * H] + bhn_b))
        h_new = n + z * (h - n)                       # == (1-z)*n + z*h
        hs_ref[t] = h_new                             # only store per step
        return h_new

    lax.fori_loop(0, T, step, jnp.zeros((BP, H), jnp.float32), unroll=True)

    # ---- Output head on the whole hidden sequence: one matmul, one store. ----
    h_all = hs_ref[...].reshape(T * BP, H)
    logits = jnp.dot(h_all, wout_ref[...],
                     preferred_element_type=jnp.float32) + bout_ref[...]
    y_ref[...] = jax.nn.sigmoid(logits)


def pack_params(params):
    """One-time parameter preprocessing (outside the per-call jit).

    Gates (r, z, n) are packed contiguously into a single 128-lane tile
    (3H = 96 <= 128); r,z biases are pre-combined (b_ih + b_hh), the n-gate
    keeps its b_hh inside the recurrence (PyTorch GRU semantics).
    """
    w_ih = params["w_ih"].astype(jnp.float32)    # (3H, F)
    w_hh = params["w_hh"].astype(jnp.float32)    # (3H, H)
    b_ih = params["b_ih"].astype(jnp.float32)    # (3H,)
    b_hh = params["b_hh"].astype(jnp.float32)    # (3H,)
    w_out = params["w_out"].astype(jnp.float32)  # (1, H)
    b_out = params["b_out"].astype(jnp.float32)  # (1,)

    H = w_hh.shape[1]
    G = 128                                      # packed gate lanes
    NP = 128                                     # lane-dense output width
    assert 3 * H <= G, "gate packing assumes 3*H <= 128"

    wih_p = jnp.pad(w_ih.T, ((0, 0), (0, G - 3 * H)))    # (F, G)
    whh_p = jnp.pad(w_hh.T, ((0, 0), (0, G - 3 * H)))    # (H, G)

    bx = jnp.concatenate([b_ih[:2 * H] + b_hh[:2 * H],   # r,z: b_ih + b_hh
                          b_ih[2 * H:3 * H]])            # n:   b_ih only
    bx = jnp.pad(bx, (0, G - 3 * H))[None, :]            # (1, G)
    bhn = b_hh[2 * H:3 * H][None, :]                     # (1, H)

    wout_p = jnp.zeros((H, NP), jnp.float32).at[:, 0].set(w_out[0, :])
    bout_p = jnp.full((1, NP), b_out[0], jnp.float32)

    return {"wih": wih_p, "whh": whh_p, "bx": bx, "bhn": bhn,
            "wout": wout_p, "bout": bout_p}


@jax.jit
def predictor_forward(x, packed):
    """x: (B, T, F) float32 (batch_first, like the PyTorch module).
    Returns sigmoid(Linear(GRU(x))) of shape (B, T, 1)."""
    B, T, F = x.shape
    H = packed["bhn"].shape[1]
    G = packed["whh"].shape[1]
    NP = packed["wout"].shape[1]
    BP = max(8, _round_up(B, 8))                 # sublane padding of the batch

    # ---- Glue: layout / padding of x only (params are pre-packed). ----
    x_tm = jnp.transpose(x, (1, 0, 2)).astype(jnp.float32)   # (T, B, F)
    x_tm = jnp.pad(x_tm, ((0, 0), (0, BP - B), (0, 0)))      # (T, BP, F)
    x_flat = x_tm.reshape(T * BP, F)                         # row = t*BP + b

    cost = pl.CostEstimate(
        flops=2 * T * BP * (F * G + H * G + H * NP),
        transcendentals=T * BP * (3 * H + NP),
        bytes_accessed=4 * (T * BP * F + F * G + H * G + 2 * G + H
                            + H * NP + NP + T * BP * NP),
    )

    y_flat = pl.pallas_call(
        gru_predictor_kernel,
        out_shape=jax.ShapeDtypeStruct((T * BP, NP), jnp.float32),
        scratch_shapes=[
            pltpu.VMEM((T, BP, G), jnp.float32),   # hoisted gate projection
            pltpu.VMEM((T, BP, H), jnp.float32),   # hidden-state sequence
        ],
        compiler_params=pltpu.CompilerParams(
            vmem_limit_bytes=32 * 1024 * 1024),
        cost_estimate=cost,
    )(x_flat, packed["wih"], packed["whh"], packed["bx"], packed["bhn"],
      packed["wout"], packed["bout"])

    # (T*BP, NP) -> (B, T, 1): strip padding, keep column 0, back to batch-first.
    y = y_flat.reshape(T, BP, NP)[:, :B, 0]      # (T, B)
    return jnp.transpose(y, (1, 0))[:, :, None]  # (B, T, 1)


def init_params(key, input_features, hidden_dim):
    """Deterministic synthetic params matching nn.GRU / nn.Linear shapes."""
    H, F = hidden_dim, input_features
    ks = jax.random.split(key, 6)
    s = 1.0 / jnp.sqrt(H)
    return {
        "w_ih": jax.random.uniform(ks[0], (3 * H, F), jnp.float32, -s, s),
        "w_hh": jax.random.uniform(ks[1], (3 * H, H), jnp.float32, -s, s),
        "b_ih": jax.random.uniform(ks[2], (3 * H,), jnp.float32, -s, s),
        "b_hh": jax.random.uniform(ks[3], (3 * H,), jnp.float32, -s, s),
        "w_out": jax.random.uniform(ks[4], (1, H), jnp.float32, -s, s),
        "b_out": jax.random.uniform(ks[5], (1,), jnp.float32, -s, s),
    }


def _reference_forward(x, params):
    """Pure-JAX GRU reference (PyTorch semantics), per-step Linear+Sigmoid."""
    B, T, F = x.shape
    H = params["w_hh"].shape[1]
    wih_t = params["w_ih"].T
    whh_t = params["w_hh"].T
    b_ih, b_hh = params["b_ih"], params["b_hh"]
    h = jnp.zeros((B, H), jnp.float32)
    ys = []
    for t in range(T):
        gx = x[:, t, :] @ wih_t + b_ih
        gh = h @ whh_t + b_hh
        r = jax.nn.sigmoid(gx[:, :H] + gh[:, :H])
        z = jax.nn.sigmoid(gx[:, H:2 * H] + gh[:, H:2 * H])
        n = jnp.tanh(gx[:, 2 * H:] + r * gh[:, 2 * H:])
        h = (1.0 - z) * n + z * h
        ys.append(jax.nn.sigmoid(h @ params["w_out"].T + params["b_out"]))
    return jnp.stack(ys, axis=1)   # (B, T, 1)


if __name__ == "__main__":
    # predictor(dim=9, hidden_dim=32, ...): GRU input_size = dim - 1 = 8.
    B, T, F, H = 4, 8, 8, 32
    key = jax.random.PRNGKey(0)
    kx, kp = jax.random.split(key)
    x = jax.random.normal(kx, (B, T, F), jnp.float32)
    params = init_params(kp, input_features=F, hidden_dim=H)

    packed = pack_params(params)          # once, outside the per-call jit
    y = predictor_forward(x, packed)
    jax.block_until_ready(y)

    y_ref = _reference_forward(x, params)
    assert y.shape == (B, T, 1)
    err = float(jnp.max(jnp.abs(y - y_ref)))
    assert jnp.allclose(y, y_ref, atol=1e-5, rtol=1e-5), err
    print("KERNEL_OK")
</pallas_src>

<mosaic_0001>
module attributes {stable_mosaic.version = 11 : i64} {
  func.func @gru_predictor_kernel(%arg0: memref<64x8xf32, #tpu.memory_space<vmem>>, %arg1: memref<8x128xf32, #tpu.memory_space<vmem>>, %arg2: memref<32x128xf32, #tpu.memory_space<vmem>>, %arg3: memref<1x128xf32, #tpu.memory_space<vmem>>, %arg4: memref<1x32xf32, #tpu.memory_space<vmem>>, %arg5: memref<32x128xf32, #tpu.memory_space<vmem>>, %arg6: memref<1x128xf32, #tpu.memory_space<vmem>>, %arg7: memref<64x128xf32, #tpu.memory_space<vmem>>, %arg8: memref<8x8x128xf32, #tpu.memory_space<vmem>>, %arg9: memref<8x8x32xf32, #tpu.memory_space<vmem>>) attributes {dimension_semantics = [], scalar_prefetch = 0 : i64, scratch_operands = 2 : i64, tpu.core_type = #tpu.core_type<tc>} {
    %c0 = arith.constant 0 : index
    %c0_0 = arith.constant 0 : index
    %0 = vector.load %arg0[%c0, %c0_0] : memref<64x8xf32, #tpu.memory_space<vmem>>, vector<64x8xf32>
    %c0_1 = arith.constant 0 : index
    %c0_2 = arith.constant 0 : index
    %1 = vector.load %arg1[%c0_1, %c0_2] : memref<8x128xf32, #tpu.memory_space<vmem>>, vector<8x128xf32>
    %cst = arith.constant dense<0.000000e+00> : vector<64x128xf32>
    %2 = tpu.matmul %0, %1, %cst {dimension_numbers = #tpu.dot_dimension_numbers<[1], [0], [0], [1], [0, 0, 1, 1], [], []>} : vector<64x8xf32>, vector<8x128xf32>, vector<64x128xf32> -> vector<64x128xf32>
    %c0_3 = arith.constant 0 : index
    %c0_4 = arith.constant 0 : index
    %3 = vector.load %arg3[%c0_3, %c0_4] : memref<1x128xf32, #tpu.memory_space<vmem>>, vector<1x128xf32>
    %4 = vector.broadcast %3 : vector<1x128xf32> to vector<64x128xf32>
    %5 = arith.addf %2, %4 : vector<64x128xf32>
    %6 = vector.shape_cast %5 : vector<64x128xf32> to vector<8x8x128xf32>
    %c0_5 = arith.constant 0 : index
    %c0_6 = arith.constant 0 : index
    %c0_7 = arith.constant 0 : index
    %7 = vector.load %arg8[%c0_5, %c0_6, %c0_7] : memref<8x8x128xf32, #tpu.memory_space<vmem>>, vector<8x8x128xf32>
    tpu.vector_store %arg8[%c0_5, %c0_6, %c0_7], %6 {strides = array<i32>} : memref<8x8x128xf32, #tpu.memory_space<vmem>>, vector<8x8x128xf32>,
    %c0_8 = arith.constant 0 : index
    %c0_9 = arith.constant 0 : index
    %8 = vector.load %arg2[%c0_8, %c0_9] : memref<32x128xf32, #tpu.memory_space<vmem>>, vector<32x128xf32>
    %c0_10 = arith.constant 0 : index
    %c0_11 = arith.constant 0 : index
    %9 = vector.load %arg4[%c0_10, %c0_11] : memref<1x32xf32, #tpu.memory_space<vmem>>, vector<1x32xf32>
    %10 = vector.shape_cast %9 : vector<1x32xf32> to vector<1x32xf32>
    %11 = vector.broadcast %10 : vector<1x32xf32> to vector<8x32xf32>
    %cst_12 = arith.constant 0.000000e+00 : f32
    %12 = vector.broadcast %cst_12 : f32 to vector<8x32xf32>
    %c0_i32 = arith.constant 0 : i32
    %13 = arith.index_cast %c0_i32 : i32 to index
    %c0_13 = arith.constant 0 : index
    %c0_14 = arith.constant 0 : index
    %14 = vector.load %arg8[%13, %c0_13, %c0_14] : memref<8x8x128xf32, #tpu.memory_space<vmem>>, vector<1x8x128xf32>
    %15 = vector.shape_cast %14 : vector<1x8x128xf32> to vector<8x128xf32>
    %cst_15 = arith.constant dense<0.000000e+00> : vector<8x128xf32>
    %16 = tpu.matmul %12, %8, %cst_15 {dimension_numbers = #tpu.dot_dimension_numbers<[1], [0], [0], [1], [0, 0, 1, 1], [], []>} : vector<8x32xf32>, vector<32x128xf32>, vector<8x128xf32> -> vector<8x128xf32>
    %17 = arith.addf %15, %16 : vector<8x128xf32>
    %18 = vector.extract_strided_slice %17 {offsets = [0, 0], sizes = [8, 64], strides = [1, 1]} : vector<8x128xf32> to vector<8x64xf32>
    %19 = arith.negf %18 : vector<8x64xf32>
    %20 = math.exp %19 : vector<8x64xf32>
    %cst_16 = arith.constant 1.000000e+00 : f32
    %21 = vector.broadcast %cst_16 : f32 to vector<8x64xf32>
    %22 = arith.addf %21, %20 : vector<8x64xf32>
    %23 = arith.divf %21, %22 : vector<8x64xf32>
    %24 = vector.extract_strided_slice %23 {offsets = [0, 0], sizes = [8, 32], strides = [1, 1]} : vector<8x64xf32> to vector<8x32xf32>
    %25 = vector.extract_strided_slice %23 {offsets = [0, 32], sizes = [8, 32], strides = [1, 1]} : vector<8x64xf32> to vector<8x32xf32>
    %26 = vector.extract_strided_slice %15 {offsets = [0, 64], sizes = [8, 32], strides = [1, 1]} : vector<8x128xf32> to vector<8x32xf32>
    %27 = vector.extract_strided_slice %16 {offsets = [0, 64], sizes = [8, 32], strides = [1, 1]} : vector<8x128xf32> to vector<8x32xf32>
    %28 = arith.addf %27, %11 : vector<8x32xf32>
    %29 = arith.mulf %24, %28 : vector<8x32xf32>
    %30 = arith.addf %26, %29 : vector<8x32xf32>
    %31 = math.tanh %30 : vector<8x32xf32>
    %32 = arith.subf %12, %31 : vector<8x32xf32>
    %33 = arith.mulf %25, %32 : vector<8x32xf32>
    %34 = arith.addf %31, %33 : vector<8x32xf32>
    %35 = arith.index_cast %c0_i32 : i32 to index
    %c0_17 = arith.constant 0 : index
    %c0_18 = arith.constant 0 : index
    %36 = vector.load %arg9[%35, %c0_17, %c0_18] : memref<8x8x32xf32, #tpu.memory_space<vmem>>, vector<1x8x32xf32>
    %37 = vector.shape_cast %36 : vector<1x8x32xf32> to vector<8x32xf32>
    %38 = vector.shape_cast %34 : vector<8x32xf32> to vector<1x8x32xf32>
    tpu.vector_store %arg9[%35, %c0_17, %c0_18], %38 {strides = array<i32>} : memref<8x8x32xf32, #tpu.memory_space<vmem>>, vector<1x8x32xf32>,
    %c1_i32 = arith.constant 1 : i32
    %39 = arith.index_cast %c1_i32 : i32 to index
    %c0_19 = arith.constant 0 : index
    %c0_20 = arith.constant 0 : index
    %40 = vector.load %arg8[%39, %c0_19, %c0_20] : memref<8x8x128xf32, #tpu.memory_space<vmem>>, vector<1x8x128xf32>
    %41 = vector.shape_cast %40 : vector<1x8x128xf32> to vector<8x128xf32>
    %cst_21 = arith.constant dense<0.000000e+00> : vector<8x128xf32>
    %42 = tpu.matmul %34, %8, %cst_21 {dimension_numbers = #tpu.dot_dimension_numbers<[1], [0], [0], [1], [0, 0, 1, 1], [], []>} : vector<8x32xf32>, vector<32x128xf32>, vector<8x128xf32> -> vector<8x128xf32>
    %43 = arith.addf %41, %42 : vector<8x128xf32>
    %44 = vector.extract_strided_slice %43 {offsets = [0, 0], sizes = [8, 64], strides = [1, 1]} : vector<8x128xf32> to vector<8x64xf32>
    %45 = arith.negf %44 : vector<8x64xf32>
    %46 = math.exp %45 : vector<8x64xf32>
    %cst_22 = arith.constant 1.000000e+00 : f32
    %47 = vector.broadcast %cst_22 : f32 to vector<8x64xf32>
    %48 = arith.addf %47, %46 : vector<8x64xf32>
    %49 = arith.divf %47, %48 : vector<8x64xf32>
    %50 = vector.extract_strided_slice %49 {offsets = [0, 0], sizes = [8, 32], strides = [1, 1]} : vector<8x64xf32> to vector<8x32xf32>
    %51 = vector.extract_strided_slice %49 {offsets = [0, 32], sizes = [8, 32], strides = [1, 1]} : vector<8x64xf32> to vector<8x32xf32>
    %52 = vector.extract_strided_slice %41 {offsets = [0, 64], sizes = [8, 32], strides = [1, 1]} : vector<8x128xf32> to vector<8x32xf32>
    %53 = vector.extract_strided_slice %42 {offsets = [0, 64], sizes = [8, 32], strides = [1, 1]} : vector<8x128xf32> to vector<8x32xf32>
    %54 = arith.addf %53, %11 : vector<8x32xf32>
    %55 = arith.mulf %50, %54 : vector<8x32xf32>
    %56 = arith.addf %52, %55 : vector<8x32xf32>
    %57 = math.tanh %56 : vector<8x32xf32>
    %58 = arith.subf %34, %57 : vector<8x32xf32>
    %59 = arith.mulf %51, %58 : vector<8x32xf32>
    %60 = arith.addf %57, %59 : vector<8x32xf32>
    %61 = arith.index_cast %c1_i32 : i32 to index
    %c0_23 = arith.constant 0 : index
    %c0_24 = arith.constant 0 : index
    %62 = vector.load %arg9[%61, %c0_23, %c0_24] : memref<8x8x32xf32, #tpu.memory_space<vmem>>, vector<1x8x32xf32>
    %63 = vector.shape_cast %62 : vector<1x8x32xf32> to vector<8x32xf32>
    %64 = vector.shape_cast %60 : vector<8x32xf32> to vector<1x8x32xf32>
    tpu.vector_store %arg9[%61, %c0_23, %c0_24], %64 {strides = array<i32>} : memref<8x8x32xf32, #tpu.memory_space<vmem>>, vector<1x8x32xf32>,
    %c2_i32 = arith.constant 2 : i32
    %65 = arith.index_cast %c2_i32 : i32 to index
    %c0_25 = arith.constant 0 : index
    %c0_26 = arith.constant 0 : index
    %66 = vector.load %arg8[%65, %c0_25, %c0_26] : memref<8x8x128xf32, #tpu.memory_space<vmem>>, vector<1x8x128xf32>
    %67 = vector.shape_cast %66 : vector<1x8x128xf32> to vector<8x128xf32>
    %cst_27 = arith.constant dense<0.000000e+00> : vector<8x128xf32>
    %68 = tpu.matmul %60, %8, %cst_27 {dimension_numbers = #tpu.dot_dimension_numbers<[1], [0], [0], [1], [0, 0, 1, 1], [], []>} : vector<8x32xf32>, vector<32x128xf32>, vector<8x128xf32> -> vector<8x128xf32>
    %69 = arith.addf %67, %68 : vector<8x128xf32>
    %70 = vector.extract_strided_slice %69 {offsets = [0, 0], sizes = [8, 64], strides = [1, 1]} : vector<8x128xf32> to vector<8x64xf32>
    %71 = arith.negf %70 : vector<8x64xf32>
    %72 = math.exp %71 : vector<8x64xf32>
    %cst_28 = arith.constant 1.000000e+00 : f32
    %73 = vector.broadcast %cst_28 : f32 to vector<8x64xf32>
    %74 = arith.addf %73, %72 : vector<8x64xf32>
    %75 = arith.divf %73, %74 : vector<8x64xf32>
    %76 = vector.extract_strided_slice %75 {offsets = [0, 0], sizes = [8, 32], strides = [1, 1]} : vector<8x64xf32> to vector<8x32xf32>
    %77 = vector.extract_strided_slice %75 {offsets = [0, 32], sizes = [8, 32], strides = [1, 1]} : vector<8x64xf32> to vector<8x32xf32>
    %78 = vector.extract_strided_slice %67 {offsets = [0, 64], sizes = [8, 32], strides = [1, 1]} : vector<8x128xf32> to vector<8x32xf32>
    %79 = vector.extract_strided_slice %68 {offsets = [0, 64], sizes = [8, 32], strides = [1, 1]} : vector<8x128xf32> to vector<8x32xf32>
    %80 = arith.addf %79, %11 : vector<8x32xf32>
    %81 = arith.mulf %76, %80 : vector<8x32xf32>
    %82 = arith.addf %78, %81 : vector<8x32xf32>
    %83 = math.tanh %82 : vector<8x32xf32>
    %84 = arith.subf %60, %83 : vector<8x32xf32>
    %85 = arith.mulf %77, %84 : vector<8x32xf32>
    %86 = arith.addf %83, %85 : vector<8x32xf32>
    %87 = arith.index_cast %c2_i32 : i32 to index
    %c0_29 = arith.constant 0 : index
    %c0_30 = arith.constant 0 : index
    %88 = vector.load %arg9[%87, %c0_29, %c0_30] : memref<8x8x32xf32, #tpu.memory_space<vmem>>, vector<1x8x32xf32>
    %89 = vector.shape_cast %88 : vector<1x8x32xf32> to vector<8x32xf32>
    %90 = vector.shape_cast %86 : vector<8x32xf32> to vector<1x8x32xf32>
    tpu.vector_store %arg9[%87, %c0_29, %c0_30], %90 {strides = array<i32>} : memref<8x8x32xf32, #tpu.memory_space<vmem>>, vector<1x8x32xf32>,
    %c3_i32 = arith.constant 3 : i32
    %91 = arith.index_cast %c3_i32 : i32 to index
    %c0_31 = arith.constant 0 : index
    %c0_32 = arith.constant 0 : index
    %92 = vector.load %arg8[%91, %c0_31, %c0_32] : memref<8x8x128xf32, #tpu.memory_space<vmem>>, vector<1x8x128xf32>
    %93 = vector.shape_cast %92 : vector<1x8x128xf32> to vector<8x128xf32>
    %cst_33 = arith.constant dense<0.000000e+00> : vector<8x128xf32>
    %94 = tpu.matmul %86, %8, %cst_33 {dimension_numbers = #tpu.dot_dimension_numbers<[1], [0], [0], [1], [0, 0, 1, 1], [], []>} : vector<8x32xf32>, vector<32x128xf32>, vector<8x128xf32> -> vector<8x128xf32>
    %95 = arith.addf %93, %94 : vector<8x128xf32>
    %96 = vector.extract_strided_slice %95 {offsets = [0, 0], sizes = [8, 64], strides = [1, 1]} : vector<8x128xf32> to vector<8x64xf32>
    %97 = arith.negf %96 : vector<8x64xf32>
    %98 = math.exp %97 : vector<8x64xf32>
    %cst_34 = arith.constant 1.000000e+00 : f32
    %99 = vector.broadcast %cst_34 : f32 to vector<8x64xf32>
    %100 = arith.addf %99, %98 : vector<8x64xf32>
    %101 = arith.divf %99, %100 : vector<8x64xf32>
    %102 = vector.extract_strided_slice %101 {offsets = [0, 0], sizes = [8, 32], strides = [1, 1]} : vector<8x64xf32> to vector<8x32xf32>
    %103 = vector.extract_strided_slice %101 {offsets = [0, 32], sizes = [8, 32], strides = [1, 1]} : vector<8x64xf32> to vector<8x32xf32>
    %104 = vector.extract_strided_slice %93 {offsets = [0, 64], sizes = [8, 32], strides = [1, 1]} : vector<8x128xf32> to vector<8x32xf32>
    %105 = vector.extract_strided_slice %94 {offsets = [0, 64], sizes = [8, 32], strides = [1, 1]} : vector<8x128xf32> to vector<8x32xf32>
    %106 = arith.addf %105, %11 : vector<8x32xf32>
    %107 = arith.mulf %102, %106 : vector<8x32xf32>
    %108 = arith.addf %104, %107 : vector<8x32xf32>
    %109 = math.tanh %108 : vector<8x32xf32>
    %110 = arith.subf %86, %109 : vector<8x32xf32>
    %111 = arith.mulf %103, %110 : vector<8x32xf32>
    %112 = arith.addf %109, %111 : vector<8x32xf32>
    %113 = arith.index_cast %c3_i32 : i32 to index
    %c0_35 = arith.constant 0 : index
    %c0_36 = arith.constant 0 : index
    %114 = vector.load %arg9[%113, %c0_35, %c0_36] : memref<8x8x32xf32, #tpu.memory_space<vmem>>, vector<1x8x32xf32>
    %115 = vector.shape_cast %114 : vector<1x8x32xf32> to vector<8x32xf32>
    %116 = vector.shape_cast %112 : vector<8x32xf32> to vector<1x8x32xf32>
    tpu.vector_store %arg9[%113, %c0_35, %c0_36], %116 {strides = array<i32>} : memref<8x8x32xf32, #tpu.memory_space<vmem>>, vector<1x8x32xf32>,
    %c4_i32 = arith.constant 4 : i32
    %117 = arith.index_cast %c4_i32 : i32 to index
    %c0_37 = arith.constant 0 : index
    %c0_38 = arith.constant 0 : index
    %118 = vector.load %arg8[%117, %c0_37, %c0_38] : memref<8x8x128xf32, #tpu.memory_space<vmem>>, vector<1x8x128xf32>
    %119 = vector.shape_cast %118 : vector<1x8x128xf32> to vector<8x128xf32>
    %cst_39 = arith.constant dense<0.000000e+00> : vector<8x128xf32>
    %120 = tpu.matmul %112, %8, %cst_39 {dimension_numbers = #tpu.dot_dimension_numbers<[1], [0], [0], [1], [0, 0, 1, 1], [], []>} : vector<8x32xf32>, vector<32x128xf32>, vector<8x128xf32> -> vector<8x128xf32>
    %121 = arith.addf %119, %120 : vector<8x128xf32>
    %122 = vector.extract_strided_slice %121 {offsets = [0, 0], sizes = [8, 64], strides = [1, 1]} : vector<8x128xf32> to vector<8x64xf32>
    %123 = arith.negf %122 : vector<8x64xf32>
    %124 = math.exp %123 : vector<8x64xf32>
    %cst_40 = arith.constant 1.000000e+00 : f32
    %125 = vector.broadcast %cst_40 : f32 to vector<8x64xf32>
    %126 = arith.addf %125, %124 : vector<8x64xf32>
    %127 = arith.divf %125, %126 : vector<8x64xf32>
    %128 = vector.extract_strided_slice %127 {offsets = [0, 0], sizes = [8, 32], strides = [1, 1]} : vector<8x64xf32> to vector<8x32xf32>
    %129 = vector.extract_strided_slice %127 {offsets = [0, 32], sizes = [8, 32], strides = [1, 1]} : vector<8x64xf32> to vector<8x32xf32>
    %130 = vector.extract_strided_slice %119 {offsets = [0, 64], sizes = [8, 32], strides = [1, 1]} : vector<8x128xf32> to vector<8x32xf32>
    %131 = vector.extract_strided_slice %120 {offsets = [0, 64], sizes = [8, 32], strides = [1, 1]} : vector<8x128xf32> to vector<8x32xf32>
    %132 = arith.addf %131, %11 : vector<8x32xf32>
    %133 = arith.mulf %128, %132 : vector<8x32xf32>
    %134 = arith.addf %130, %133 : vector<8x32xf32>
    %135 = math.tanh %134 : vector<8x32xf32>
    %136 = arith.subf %112, %135 : vector<8x32xf32>
    %137 = arith.mulf %129, %136 : vector<8x32xf32>
    %138 = arith.addf %135, %137 : vector<8x32xf32>
    %139 = arith.index_cast %c4_i32 : i32 to index
    %c0_41 = arith.constant 0 : index
    %c0_42 = arith.constant 0 : index
    %140 = vector.load %arg9[%139, %c0_41, %c0_42] : memref<8x8x32xf32, #tpu.memory_space<vmem>>, vector<1x8x32xf32>
    %141 = vector.shape_cast %140 : vector<1x8x32xf32> to vector<8x32xf32>
    %142 = vector.shape_cast %138 : vector<8x32xf32> to vector<1x8x32xf32>
    tpu.vector_store %arg9[%139, %c0_41, %c0_42], %142 {strides = array<i32>} : memref<8x8x32xf32, #tpu.memory_space<vmem>>, vector<1x8x32xf32>,
    %c5_i32 = arith.constant 5 : i32
    %143 = arith.index_cast %c5_i32 : i32 to index
    %c0_43 = arith.constant 0 : index
    %c0_44 = arith.constant 0 : index
    %144 = vector.load %arg8[%143, %c0_43, %c0_44] : memref<8x8x128xf32, #tpu.memory_space<vmem>>, vector<1x8x128xf32>
    %145 = vector.shape_cast %144 : vector<1x8x128xf32> to vector<8x128xf32>
    %cst_45 = arith.constant dense<0.000000e+00> : vector<8x128xf32>
    %146 = tpu.matmul %138, %8, %cst_45 {dimension_numbers = #tpu.dot_dimension_numbers<[1], [0], [0], [1], [0, 0, 1, 1], [], []>} : vector<8x32xf32>, vector<32x128xf32>, vector<8x128xf32> -> vector<8x128xf32>
    %147 = arith.addf %145, %146 : vector<8x128xf32>
    %148 = vector.extract_strided_slice %147 {offsets = [0, 0], sizes = [8, 64], strides = [1, 1]} : vector<8x128xf32> to vector<8x64xf32>
    %149 = arith.negf %148 : vector<8x64xf32>
    %150 = math.exp %149 : vector<8x64xf32>
    %cst_46 = arith.constant 1.000000e+00 : f32
    %151 = vector.broadcast %cst_46 : f32 to vector<8x64xf32>
    %152 = arith.addf %151, %150 : vector<8x64xf32>
    %153 = arith.divf %151, %152 : vector<8x64xf32>
    %154 = vector.extract_strided_slice %153 {offsets = [0, 0], sizes = [8, 32], strides = [1, 1]} : vector<8x64xf32> to vector<8x32xf32>
    %155 = vector.extract_strided_slice %153 {offsets = [0, 32], sizes = [8, 32], strides = [1, 1]} : vector<8x64xf32> to vector<8x32xf32>
    %156 = vector.extract_strided_slice %145 {offsets = [0, 64], sizes = [8, 32], strides = [1, 1]} : vector<8x128xf32> to vector<8x32xf32>
    %157 = vector.extract_strided_slice %146 {offsets = [0, 64], sizes = [8, 32], strides = [1, 1]} : vector<8x128xf32> to vector<8x32xf32>
    %158 = arith.addf %157, %11 : vector<8x32xf32>
    %159 = arith.mulf %154, %158 : vector<8x32xf32>
    %160 = arith.addf %156, %159 : vector<8x32xf32>
    %161 = math.tanh %160 : vector<8x32xf32>
    %162 = arith.subf %138, %161 : vector<8x32xf32>
    %163 = arith.mulf %155, %162 : vector<8x32xf32>
    %164 = arith.addf %161, %163 : vector<8x32xf32>
    %165 = arith.index_cast %c5_i32 : i32 to index
    %c0_47 = arith.constant 0 : index
    %c0_48 = arith.constant 0 : index
    %166 = vector.load %arg9[%165, %c0_47, %c0_48] : memref<8x8x32xf32, #tpu.memory_space<vmem>>, vector<1x8x32xf32>
    %167 = vector.shape_cast %166 : vector<1x8x32xf32> to vector<8x32xf32>
    %168 = vector.shape_cast %164 : vector<8x32xf32> to vector<1x8x32xf32>
    tpu.vector_store %arg9[%165, %c0_47, %c0_48], %168 {strides = array<i32>} : memref<8x8x32xf32, #tpu.memory_space<vmem>>, vector<1x8x32xf32>,
    %c6_i32 = arith.constant 6 : i32
    %169 = arith.index_cast %c6_i32 : i32 to index
    %c0_49 = arith.constant 0 : index
    %c0_50 = arith.constant 0 : index
    %170 = vector.load %arg8[%169, %c0_49, %c0_50] : memref<8x8x128xf32, #tpu.memory_space<vmem>>, vector<1x8x128xf32>
    %171 = vector.shape_cast %170 : vector<1x8x128xf32> to vector<8x128xf32>
    %cst_51 = arith.constant dense<0.000000e+00> : vector<8x128xf32>
    %172 = tpu.matmul %164, %8, %cst_51 {dimension_numbers = #tpu.dot_dimension_numbers<[1], [0], [0], [1], [0, 0, 1, 1], [], []>} : vector<8x32xf32>, vector<32x128xf32>, vector<8x128xf32> -> vector<8x128xf32>
    %173 = arith.addf %171, %172 : vector<8x128xf32>
    %174 = vector.extract_strided_slice %173 {offsets = [0, 0], sizes = [8, 64], strides = [1, 1]} : vector<8x128xf32> to vector<8x64xf32>
    %175 = arith.negf %174 : vector<8x64xf32>
    %176 = math.exp %175 : vector<8x64xf32>
    %cst_52 = arith.constant 1.000000e+00 : f32
    %177 = vector.broadcast %cst_52 : f32 to vector<8x64xf32>
    %178 = arith.addf %177, %176 : vector<8x64xf32>
    %179 = arith.divf %177, %178 : vector<8x64xf32>
    %180 = vector.extract_strided_slice %179 {offsets = [0, 0], sizes = [8, 32], strides = [1, 1]} : vector<8x64xf32> to vector<8x32xf32>
    %181 = vector.extract_strided_slice %179 {offsets = [0, 32], sizes = [8, 32], strides = [1, 1]} : vector<8x64xf32> to vector<8x32xf32>
    %182 = vector.extract_strided_slice %171 {offsets = [0, 64], sizes = [8, 32], strides = [1, 1]} : vector<8x128xf32> to vector<8x32xf32>
    %183 = vector.extract_strided_slice %172 {offsets = [0, 64], sizes = [8, 32], strides = [1, 1]} : vector<8x128xf32> to vector<8x32xf32>
    %184 = arith.addf %183, %11 : vector<8x32xf32>
    %185 = arith.mulf %180, %184 : vector<8x32xf32>
    %186 = arith.addf %182, %185 : vector<8x32xf32>
    %187 = math.tanh %186 : vector<8x32xf32>
    %188 = arith.subf %164, %187 : vector<8x32xf32>
    %189 = arith.mulf %181, %188 : vector<8x32xf32>
    %190 = arith.addf %187, %189 : vector<8x32xf32>
    %191 = arith.index_cast %c6_i32 : i32 to index
    %c0_53 = arith.constant 0 : index
    %c0_54 = arith.constant 0 : index
    %192 = vector.load %arg9[%191, %c0_53, %c0_54] : memref<8x8x32xf32, #tpu.memory_space<vmem>>, vector<1x8x32xf32>
    %193 = vector.shape_cast %192 : vector<1x8x32xf32> to vector<8x32xf32>
    %194 = vector.shape_cast %190 : vector<8x32xf32> to vector<1x8x32xf32>
    tpu.vector_store %arg9[%191, %c0_53, %c0_54], %194 {strides = array<i32>} : memref<8x8x32xf32, #tpu.memory_space<vmem>>, vector<1x8x32xf32>,
    %c7_i32 = arith.constant 7 : i32
    %195 = arith.index_cast %c7_i32 : i32 to index
    %c0_55 = arith.constant 0 : index
    %c0_56 = arith.constant 0 : index
    %196 = vector.load %arg8[%195, %c0_55, %c0_56] : memref<8x8x128xf32, #tpu.memory_space<vmem>>, vector<1x8x128xf32>
    %197 = vector.shape_cast %196 : vector<1x8x128xf32> to vector<8x128xf32>
    %cst_57 = arith.constant dense<0.000000e+00> : vector<8x128xf32>
    %198 = tpu.matmul %190, %8, %cst_57 {dimension_numbers = #tpu.dot_dimension_numbers<[1], [0], [0], [1], [0, 0, 1, 1], [], []>} : vector<8x32xf32>, vector<32x128xf32>, vector<8x128xf32> -> vector<8x128xf32>
    %199 = arith.addf %197, %198 : vector<8x128xf32>
    %200 = vector.extract_strided_slice %199 {offsets = [0, 0], sizes = [8, 64], strides = [1, 1]} : vector<8x128xf32> to vector<8x64xf32>
    %201 = arith.negf %200 : vector<8x64xf32>
    %202 = math.exp %201 : vector<8x64xf32>
    %cst_58 = arith.constant 1.000000e+00 : f32
    %203 = vector.broadcast %cst_58 : f32 to vector<8x64xf32>
    %204 = arith.addf %203, %202 : vector<8x64xf32>
    %205 = arith.divf %203, %204 : vector<8x64xf32>
    %206 = vector.extract_strided_slice %205 {offsets = [0, 0], sizes = [8, 32], strides = [1, 1]} : vector<8x64xf32> to vector<8x32xf32>
    %207 = vector.extract_strided_slice %205 {offsets = [0, 32], sizes = [8, 32], strides = [1, 1]} : vector<8x64xf32> to vector<8x32xf32>
    %208 = vector.extract_strided_slice %197 {offsets = [0, 64], sizes = [8, 32], strides = [1, 1]} : vector<8x128xf32> to vector<8x32xf32>
    %209 = vector.extract_strided_slice %198 {offsets = [0, 64], sizes = [8, 32], strides = [1, 1]} : vector<8x128xf32> to vector<8x32xf32>
    %210 = arith.addf %209, %11 : vector<8x32xf32>
    %211 = arith.mulf %206, %210 : vector<8x32xf32>
    %212 = arith.addf %208, %211 : vector<8x32xf32>
    %213 = math.tanh %212 : vector<8x32xf32>
    %214 = arith.subf %190, %213 : vector<8x32xf32>
    %215 = arith.mulf %207, %214 : vector<8x32xf32>
    %216 = arith.addf %213, %215 : vector<8x32xf32>
    %217 = arith.index_cast %c7_i32 : i32 to index
    %c0_59 = arith.constant 0 : index
    %c0_60 = arith.constant 0 : index
    %218 = vector.load %arg9[%217, %c0_59, %c0_60] : memref<8x8x32xf32, #tpu.memory_space<vmem>>, vector<1x8x32xf32>
    %219 = vector.shape_cast %218 : vector<1x8x32xf32> to vector<8x32xf32>
    %220 = vector.shape_cast %216 : vector<8x32xf32> to vector<1x8x32xf32>
    tpu.vector_store %arg9[%217, %c0_59, %c0_60], %220 {strides = array<i32>} : memref<8x8x32xf32, #tpu.memory_space<vmem>>, vector<1x8x32xf32>,
    %c8_i32 = arith.constant 8 : i32
    %c0_61 = arith.constant 0 : index
    %c0_62 = arith.constant 0 : index
    %c0_63 = arith.constant 0 : index
    %221 = vector.load %arg9[%c0_61, %c0_62, %c0_63] : memref<8x8x32xf32, #tpu.memory_space<vmem>>, vector<8x8x32xf32>
    %222 = vector.shape_cast %221 : vector<8x8x32xf32> to vector<64x32xf32>
    %c0_64 = arith.constant 0 : index
    %c0_65 = arith.constant 0 : index
    %223 = vector.load %arg5[%c0_64, %c0_65] : memref<32x128xf32, #tpu.memory_space<vmem>>, vector<32x128xf32>
    %cst_66 = arith.constant dense<0.000000e+00> : vector<64x128xf32>
    %224 = tpu.matmul %222, %223, %cst_66 {dimension_numbers = #tpu.dot_dimension_numbers<[1], [0], [0], [1], [0, 0, 1, 1], [], []>} : vector<64x32xf32>, vector<32x128xf32>, vector<64x128xf32> -> vector<64x128xf32>
    %c0_67 = arith.constant 0 : index
    %c0_68 = arith.constant 0 : index
    %225 = vector.load %arg6[%c0_67, %c0_68] : memref<1x128xf32, #tpu.memory_space<vmem>>, vector<1x128xf32>
    %226 = vector.broadcast %225 : vector<1x128xf32> to vector<64x128xf32>
    %227 = arith.addf %224, %226 : vector<64x128xf32>
    %228 = arith.negf %227 : vector<64x128xf32>
    %229 = math.exp %228 : vector<64x128xf32>
    %cst_69 = arith.constant 1.000000e+00 : f32
    %230 = vector.broadcast %cst_69 : f32 to vector<64x128xf32>
    %231 = arith.addf %230, %229 : vector<64x128xf32>
    %232 = arith.divf %230, %231 : vector<64x128xf32>
    %c0_70 = arith.constant 0 : index
    %c0_71 = arith.constant 0 : index
    %233 = vector.load %arg7[%c0_70, %c0_71] : memref<64x128xf32, #tpu.memory_space<vmem>>, vector<64x128xf32>
    tpu.vector_store %arg7[%c0_70, %c0_71], %232 {strides = array<i32>} : memref<64x128xf32, #tpu.memory_space<vmem>>, vector<64x128xf32>,
    return
  }
}

</mosaic_0001>

<bundles_post_ra>
// kernel: predictor_forward.1
= control target key start
LH: loop header
LB: loop body
LE: loop exit
PB: predicated region body
PF: predicated region fallthrough
CT: control target
= control target key end

     0   :  { %vm39_vm0 = vcmask 64512   ;;  %s1083_s14 = smov 64   ;;  %v1084_v8 = vmov 0.0   ;;  %s1086_s17 = smov 32   ;;  %vm121_vm5 = vcmask 261120   ;;  %s1368_s1 = inlined_call_operand.vmem [shape: f32[8,128], index: 1, kind: input, shape index: {}]   ;;  %s1369_s0 = inlined_call_operand.vmem [shape: f32[64,8], index: 0, kind: input, shape index: {}]   ;;  %s1370_s2 = inlined_call_operand.vmem [shape: f32[32,128], index: 2, kind: input, shape index: {}]   ;;  %s1371_s4 = inlined_call_operand.vmem [shape: f32[1,32], index: 4, kind: input, shape index: {}]   ;;  %s1372_s3 = inlined_call_operand.vmem [shape: f32[1,128], index: 3, kind: input, shape index: {}]   ;;  %s1373_s5 = inlined_call_operand.vmem [shape: f32[32,128], index: 5, kind: input, shape index: {}]   ;;  %s1374_s6 = inlined_call_operand.vmem [shape: f32[1,128], index: 6, kind: input, shape index: {}]   ;;  %s1375_s7 = inlined_call_operand.vmem [shape: f32[64,128], index: 7, kind: output, shape index: {}]  }
   0x1   :  { %v34_v0 = vld [vmem:[%s1368_s1] sm:$0xff]  ;;  %v33_v1 = vld [vmem:[%s1369_s0 + $0x38] sm:$0xff]  ;;  %v1141_v3 = vld [vmem:[%s1370_s2 + $0x10] sm:$0xff] }
   0x2   :  { %v1136_v2 = vld [vmem:[%s1370_s2 + $0x18] sm:$0xff]  ;;  %991 = vmatpush.msra.mxu2 %v34_v0  ;;  %79 = vmatpush.msra.mxu0 %v34_v0  ;;  %v26_v4 = vld [vmem:[%s1369_s0] sm:$0xff]  ;;  %v1156_v6 = vld [vmem:[%s1370_s2 + $0x8] sm:$0xff] }
   0x3   :  { %959 = vmatmul.msk.f32.vlgmr.msra.gmra.mxu2 %vm39_vm0, %v33_v1  ;;  %v1000_v5 = vld [vmem:[%s1371_s4] ss:$0 sm:$0xff]  ;;  %285 = vmatpush.msra.mxu3 %v1136_v2  ;;  %v27_v40 = vld [vmem:[%s1369_s0 + $0x8] sm:$0xff] }
   0x4   :  { %137 = vmatpush.msrb.mxu2 %v1136_v2  ;;  %952 = vmatmul.msk.f32.vlgmr.msra.gmra.mxu0 %vm39_vm0, %v26_v4  ;;  %v1165_v7 = vld [vmem:[%s1370_s2] sm:$0xff] }
   0x5   :  { %165 = vrot.lane.b32.xlu0 %v1000_v5, %s1083_s14  ;;  %286 = vmatpush.msra.mxu3 %v1141_v3  ;;  %v1199_v14 = vld [vmem:[%s1372_s3] ss:$0 sm:$0xff]  ;;  %s1085_s3 = smov 96  }
   0x6   :  { %138 = vmatpush.msrb.mxu2 %v1141_v3  ;;  %358 = vmatpush.msra.mxu1 %v1136_v2 }
   0x7   :  { %287 = vmatpush.msra.mxu3 %v1156_v6 }
   0x8   :  { %139 = vmatpush.msrb.mxu2 %v1156_v6  ;;  %359 = vmatpush.msra.mxu1 %v1141_v3 }
   0x9   :  { %288 = vmatpush.msra.mxu3 %v1165_v7 }
   0xa   :  { %140 = vmatpush.msrb.mxu2 %v1165_v7  ;;  %360 = vmatpush.msra.mxu1 %v1156_v6 }
   0xb   :  { %141 = vmatmul.f32.vlgmr.msrb.gmra.mxu2 %v1084_v8  ;;  %504 = vmatpush.msrb.mxu3 %v1136_v2 }
   0xc   :  { %212 = vmatpush.msra.mxu2 %v1136_v2  ;;  %361 = vmatpush.msra.mxu1 %v1165_v7 }
   0xd   :  { %505 = vmatpush.msrb.mxu3 %v1141_v3  ;;  %953 = vmatmul.msk.f32.gmra.mxu0 %vm39_vm0, %v27_v40 }
   0xe   :  { %577 = vmatpush.msrb.mxu1 %v1136_v2  ;;  %213 = vmatpush.msra.mxu2 %v1141_v3 }
   0xf   :  { %506 = vmatpush.msrb.mxu3 %v1156_v6 }
  0x10   :  { %578 = vmatpush.msrb.mxu1 %v1141_v3  ;;  %214 = vmatpush.msra.mxu2 %v1156_v6 }
  0x11   :  { %507 = vmatpush.msrb.mxu3 %v1165_v7 }
  0x12   :  { %579 = vmatpush.msrb.mxu1 %v1156_v6  ;;  %215 = vmatpush.msra.mxu2 %v1165_v7 }
  0x14   :  { %431 = vmatpush.msrb.mxu2 %v1136_v2  ;;  %580 = vmatpush.msrb.mxu1 %v1165_v7 }
  0x16   :  { %432 = vmatpush.msrb.mxu2 %v1141_v3 }
  0x18   :  { %433 = vmatpush.msrb.mxu2 %v1156_v6 }
  0x1a   :  { %434 = vmatpush.msrb.mxu2 %v1165_v7 }
  0x77   :  { %v1192_v10 = vpop.permute.xlu0 %165 }
  0x81   :  { %v81_v13 = vpop.f32.mrf.mxu0 }
  0x82   :  { %v82_v15 = vadd.f32 %v1199_v14, %v81_v13 }
  0x86   :  { %v1190_v9 = vpop.f32.mrf.mxu2 }
  0x8a   :  { %v84_v44 = vpop.f32.mrf.mxu0 }
  0x8b   :  { %v85_v45 = vadd.f32 %v1199_v14, %v84_v44 }
  0x8e   :  { %v142_v11 = vpop.f32.mrf.mxu2 }
  0x8f   :  { %v168_v12 = vadd.f32 %v1192_v10, %v142_v11  ;;  %v145_v16 = vadd.f32 %v142_v11, %v82_v15 }
  0x91   :  { %170 = vrot.lane.b32.xlu0 %v168_v12, %s1083_s14  ;;  %v960_v17 = vmul.f32 -1.442695, %v145_v16 }
  0x93   :  { %1003 = vpow2.f32 %v960_v17 }
  0x99   :  { %v1004_v18 = vpop.eup %1003 }
  0x9a   :  { %v149_v19 = vadd.f32 1.0, %v1004_v18 }
  0x9c   :  { %1005 = vrcp.f32 %v149_v19  ;;  %v161_v25 = vand.u32 2147483648, %v149_v19  ;;  %vm155_vm2 = vweird.f32 %v149_v19  ;;  %v159_v26 = vand.u32 2147483647, %v149_v19 }
  0x9e   :  { %v162_v28 = vor.u32 1.1754944e-38, %v161_v25  ;;  %vm160_vm4 = vcmp.eq.f32.partialorder %v159_v26, 8.507059e+37 }
  0xa2   :  { %v1006_v20 = vpop.eup %1005 }
  0xa3   :  { %v151_v21 = vmul.f32 %v1006_v20, %v149_v19  ;;  %vm156_vm1 = vweird.f32 %v1006_v20 }
  0xa4   :  { %vm157_vm3 = vmor %vm155_vm2, %vm156_vm1 }
  0xa5   :  { %v152_v22 = vsub.f32 1.0, %v151_v21 }
  0xa7   :  { %v153_v23 = vmul.f32 %v1006_v20, %v152_v22 }
  0xa9   :  { %v154_v24 = vadd.f32 %v1006_v20, %v153_v23 }
  0xab   :  { %v158_v27 = vsel %vm157_vm3, %v1006_v20, %v154_v24 }
  0xac   :  { %v163_v30 = vsel %vm160_vm4, %v162_v28, %v158_v27 }
 0x103   :  { %v171_v29 = vpop.permute.xlu0 %170 }
 0x104   :  { %v173_v31 = vmul.f32 %v171_v29, %v163_v30 }
 0x106   :  { %175 = vrot.lane.b32.xlu1 %v173_v31, %s1083_s14 }
 0x178   :  { %v176_v32 = vpop.permute.xlu1 %175 }
 0x179   :  { %v178_v33 = vadd.f32 %v176_v32, %v82_v15 }
 0x17b   :  { %1007 = vtanh.f32 %v178_v33 }
 0x181   :  { %v1008_v34 = vpop.eup %1007 }
 0x182   :  { %v180_v35 = vsub.f32 0.0, %v1008_v34 }
 0x184   :  { %182 = vrot.lane.b32.xlu1 %v180_v35, %s1085_s3 }
 0x1f6   :  { %v183_v36 = vpop.permute.xlu1 %182 }
 0x1f7   :  { %v185_v37 = vmul.f32 %v183_v36, %v163_v30 }
 0x1f9   :  { %187 = vrot.lane.b32.xlu2 %v185_v37, %s1086_s17  ;;  %v29_v37 = vld [vmem:[%s1369_s0 + $0x18] sm:$0xff] }
 0x253   :  { %v188_v38 = vpop.permute.xlu2 %187 }
 0x254   :  { %v190_v39 = vadd.f32 %v1008_v34, %v188_v38 }
 0x256   :  { %192 = vrot.lane.b32.xlu2 %v190_v39, %s1083_s14 }
 0x2b0   :  { %v193_v41 = vpop.permute.xlu2 %192 }
 0x2b1   :  { %195 = vst.msk [vmem:[#allocation3] sm:$0xff] %vm121_vm5, %v193_v41  ;;  %961 = vmatmul.msk.f32.vlgmr.msra.gmra.mxu2 %vm121_vm5, %v193_v41 }
 0x2b2   :  { %650 = vmatpush.msra.mxu2 %v1136_v2 }
 0x2b4   :  { %651 = vmatpush.msra.mxu2 %v1141_v3 }
 0x2b6   :  { %652 = vmatpush.msra.mxu2 %v1156_v6  ;;  %v28_v6 = vld [vmem:[%s1369_s0 + $0x10] sm:$0xff] }
 0x2b7   :  { %954 = vmatmul.msk.f32.gmra.mxu0 %vm39_vm0, %v28_v6 }
 0x2b8   :  { %653 = vmatpush.msra.mxu2 %v1165_v7 }
 0x2bf   :  { %955 = vmatmul.msk.f32.gmra.mxu0 %vm39_vm0, %v29_v37 }
 0x334   :  { %v217_v42 = vpop.f32.mrf.mxu2  ;;  %v87_v12 = vpop.f32.mrf.mxu0 }
 0x335   :  { %v240_v43 = vadd.f32 %v217_v42, %v1192_v10  ;;  %v220_v46 = vadd.f32 %v217_v42, %v85_v45  ;;  %v88_v13 = vadd.f32 %v1199_v14, %v87_v12 }
 0x337   :  { %242 = vrot.lane.b32.xlu0 %v240_v43, %s1083_s14  ;;  %v962_v47 = vmul.f32 -1.442695, %v220_v46 }
 0x339   :  { %1009 = vpow2.f32 %v962_v47 }
 0x33c   :  { %v90_v43 = vpop.f32.mrf.mxu0 }
 0x33d   :  { %v91_v44 = vadd.f32 %v1199_v14, %v90_v43 }
 0x33f   :  { %v1010_v48 = vpop.eup %1009 }
 0x340   :  { %v224_v49 = vadd.f32 1.0, %v1010_v48 }
 0x342   :  { %1011 = vrcp.f32 %v224_v49  ;;  %v236_v55 = vand.u32 2147483648, %v224_v49  ;;  %vm230_vm7 = vweird.f32 %v224_v49  ;;  %v234_v56 = vand.u32 2147483647, %v224_v49 }
 0x344   :  { %v237_v58 = vor.u32 1.1754944e-38, %v236_v55  ;;  %vm235_vm9 = vcmp.eq.f32.partialorder %v234_v56, 8.507059e+37 }
 0x348   :  { %v1012_v50 = vpop.eup %1011 }
 0x349   :  { %v226_v51 = vmul.f32 %v1012_v50, %v224_v49  ;;  %vm231_vm6 = vweird.f32 %v1012_v50 }
 0x34a   :  { %vm232_vm8 = vmor %vm230_vm7, %vm231_vm6 }
 0x34b   :  { %v227_v52 = vsub.f32 1.0, %v226_v51 }
 0x34d   :  { %v228_v53 = vmul.f32 %v1012_v50, %v227_v52 }
 0x34f   :  { %v229_v54 = vadd.f32 %v1012_v50, %v228_v53 }
 0x351   :  { %v233_v57 = vsel %vm232_vm8, %v1012_v50, %v229_v54 }
 0x352   :  { %v238_v60 = vsel %vm235_vm9, %v237_v58, %v233_v57 }
 0x3a9   :  { %v243_v59 = vpop.permute.xlu0 %242 }
 0x3aa   :  { %v245_v61 = vmul.f32 %v243_v59, %v238_v60 }
 0x3ac   :  { %247 = vrot.lane.b32.xlu1 %v245_v61, %s1083_s14 }
 0x41e   :  { %v248_v62 = vpop.permute.xlu1 %247 }
 0x41f   :  { %v250_v63 = vadd.f32 %v248_v62, %v85_v45 }
 0x421   :  { %1013 = vtanh.f32 %v250_v63 }
 0x427   :  { %v1014_v0 = vpop.eup %1013 }
 0x428   :  { %v252_v1 = vsub.f32 %v190_v39, %v1014_v0 }
 0x42a   :  { %254 = vrot.lane.b32.xlu2 %v252_v1, %s1085_s3 }
 0x484   :  { %v255_v2 = vpop.permute.xlu2 %254 }
 0x485   :  { %v257_v3 = vmul.f32 %v255_v2, %v238_v60 }
 0x487   :  { %259 = vrot.lane.b32.xlu0 %v257_v3, %s1086_s17 }
 0x4f9   :  { %v260_v4 = vpop.permute.xlu0 %259 }
 0x4fa   :  { %v262_v5 = vadd.f32 %v1014_v0, %v260_v4 }
 0x4fc   :  { %264 = vrot.lane.b32.xlu1 %v262_v5, %s1083_s14 }
 0x56e   :  { %v265_v7 = vpop.permute.xlu1 %264 }
 0x56f   :  { %268 = vst.msk [vmem:[#allocation3 + $0x8] sm:$0xff] %vm121_vm5, %v265_v7  ;;  %963 = vmatmul.msk.f32.vlgmr.msra.gmra.mxu3 %vm121_vm5, %v265_v7 }
 0x5f2   :  { %v290_v8 = vpop.f32.mrf.mxu3 }
 0x5f3   :  { %v313_v11 = vadd.f32 %v290_v8, %v1192_v10  ;;  %v293_v15 = vadd.f32 %v290_v8, %v88_v13 }
 0x5f5   :  { %315 = vrot.lane.b32.xlu2 %v313_v11, %s1083_s14  ;;  %v964_v16 = vmul.f32 -1.442695, %v293_v15 }
 0x5f7   :  { %1015 = vpow2.f32 %v964_v16 }
 0x5fd   :  { %v1016_v17 = vpop.eup %1015 }
 0x5fe   :  { %v297_v18 = vadd.f32 1.0, %v1016_v17 }
 0x600   :  { %1017 = vrcp.f32 %v297_v18  ;;  %v309_v24 = vand.u32 2147483648, %v297_v18  ;;  %vm303_vm11 = vweird.f32 %v297_v18  ;;  %v307_v25 = vand.u32 2147483647, %v297_v18 }
 0x602   :  { %v310_v27 = vor.u32 1.1754944e-38, %v309_v24  ;;  %vm308_vm13 = vcmp.eq.f32.partialorder %v307_v25, 8.507059e+37 }
 0x606   :  { %v1018_v19 = vpop.eup %1017 }
 0x607   :  { %v299_v20 = vmul.f32 %v1018_v19, %v297_v18  ;;  %vm304_vm10 = vweird.f32 %v1018_v19 }
 0x608   :  { %vm305_vm12 = vmor %vm303_vm11, %vm304_vm10 }
 0x609   :  { %v300_v21 = vsub.f32 1.0, %v299_v20 }
 0x60b   :  { %v301_v22 = vmul.f32 %v1018_v19, %v300_v21 }
 0x60d   :  { %v302_v23 = vadd.f32 %v1018_v19, %v301_v22 }
 0x60f   :  { %v306_v26 = vsel %vm305_vm12, %v1018_v19, %v302_v23 }
 0x610   :  { %v311_v29 = vsel %vm308_vm13, %v310_v27, %v306_v26 }
 0x64f   :  { %v316_v28 = vpop.permute.xlu2 %315 }
 0x650   :  { %v318_v30 = vmul.f32 %v316_v28, %v311_v29 }
 0x652   :  { %320 = vrot.lane.b32.xlu0 %v318_v30, %s1083_s14 }
 0x6c4   :  { %v321_v31 = vpop.permute.xlu0 %320 }
 0x6c5   :  { %v323_v32 = vadd.f32 %v321_v31, %v88_v13 }
 0x6c7   :  { %1019 = vtanh.f32 %v323_v32 }
 0x6cd   :  { %v1020_v33 = vpop.eup %1019 }
 0x6ce   :  { %v325_v34 = vsub.f32 %v262_v5, %v1020_v33  ;;  %v30_v5 = vld [vmem:[%s1369_s0 + $0x20] sm:$0xff] }
 0x6cf   :  { %956 = vmatmul.msk.f32.gmra.mxu0 %vm39_vm0, %v30_v5 }
 0x6d0   :  { %327 = vrot.lane.b32.xlu1 %v325_v34, %s1085_s3 }
 0x742   :  { %v328_v35 = vpop.permute.xlu1 %327 }
 0x743   :  { %v330_v36 = vmul.f32 %v328_v35, %v311_v29 }
 0x745   :  { %332 = vrot.lane.b32.xlu2 %v330_v36, %s1086_s17 }
 0x74c   :  { %v93_v11 = vpop.f32.mrf.mxu0 }
 0x74d   :  { %v94_v12 = vadd.f32 %v1199_v14, %v93_v11 }
 0x79f   :  { %v333_v38 = vpop.permute.xlu2 %332 }
 0x7a0   :  { %v335_v39 = vadd.f32 %v1020_v33, %v333_v38  ;;  %v718_v38 = vld [vmem:[%s1373_s5 + $0x18] sm:$0xff] }
 0x7a1   :  { %992 = vmatpush.msra.mxu3 %v718_v38 }
 0x7a2   :  { %337 = vrot.lane.b32.xlu0 %v335_v39, %s1083_s14 }
 0x814   :  { %v338_v40 = vpop.permute.xlu0 %337 }
 0x815   :  { %341 = vst.msk [vmem:[#allocation3 + $0x10] sm:$0xff] %vm121_vm5, %v338_v40  ;;  %965 = vmatmul.msk.f32.vlgmr.msra.gmra.mxu1 %vm121_vm5, %v338_v40  ;;  %v31_v40 = vld [vmem:[%s1369_s0 + $0x28] sm:$0xff] }
 0x816   :  { %957 = vmatmul.msk.f32.gmra.mxu0 %vm39_vm0, %v31_v40  ;;  %759 = vmatpush.msra.mxu1 %v718_v38 }
 0x892   :  { %v363_v41 = vpop.f32.mrf.mxu1 }
 0x893   :  { %v386_v42 = vadd.f32 %v363_v41, %v1192_v10  ;;  %v366_v45 = vadd.f32 %v363_v41, %v91_v44  ;;  %v716_v41 = vld [vmem:[%s1373_s5 + $0x8] sm:$0xff] }
 0x895   :  { %388 = vrot.lane.b32.xlu1 %v386_v42, %s1083_s14  ;;  %v966_v46 = vmul.f32 -1.442695, %v366_v45  ;;  %v715_v42 = vld [vmem:[%s1373_s5] sm:$0xff] }
 0x897   :  { %1021 = vpow2.f32 %v966_v46 }
 0x89d   :  { %v1022_v47 = vpop.eup %1021 }
 0x89e   :  { %v370_v48 = vadd.f32 1.0, %v1022_v47  ;;  %v1289_v47 = vld [vmem:[%s1374_s6] ss:$0 sm:$0xff] }
 0x8a0   :  { %1023 = vrcp.f32 %v370_v48  ;;  %v382_v54 = vand.u32 2147483648, %v370_v48  ;;  %vm376_vm15 = vweird.f32 %v370_v48  ;;  %v380_v55 = vand.u32 2147483647, %v370_v48 }
 0x8a2   :  { %v383_v57 = vor.u32 1.1754944e-38, %v382_v54  ;;  %vm381_vm2 = vcmp.eq.f32.partialorder %v380_v55, 8.507059e+37 }
 0x8a6   :  { %v1024_v49 = vpop.eup %1023 }
 0x8a7   :  { %v372_v50 = vmul.f32 %v1024_v49, %v370_v48  ;;  %vm377_vm14 = vweird.f32 %v1024_v49 }
 0x8a8   :  { %vm378_vm1 = vmor %vm376_vm15, %vm377_vm14 }
 0x8a9   :  { %v373_v51 = vsub.f32 1.0, %v372_v50 }
 0x8ab   :  { %v374_v52 = vmul.f32 %v1024_v49, %v373_v51 }
 0x8ad   :  { %v375_v53 = vadd.f32 %v1024_v49, %v374_v52 }
 0x8af   :  { %v379_v56 = vsel %vm378_vm1, %v1024_v49, %v375_v53 }
 0x8b0   :  { %v384_v59 = vsel %vm381_vm2, %v383_v57, %v379_v56 }
 0x907   :  { %v389_v58 = vpop.permute.xlu1 %388 }
 0x908   :  { %v391_v60 = vmul.f32 %v389_v58, %v384_v59 }
 0x90a   :  { %393 = vrot.lane.b32.xlu2 %v391_v60, %s1083_s14 }
 0x964   :  { %v394_v61 = vpop.permute.xlu2 %393 }
 0x965   :  { %v396_v62 = vadd.f32 %v394_v61, %v91_v44  ;;  %v96_v61 = vpop.f32.mrf.mxu0 }
 0x967   :  { %1025 = vtanh.f32 %v396_v62 }
 0x96d   :  { %v1026_v63 = vpop.eup %1025 }
 0x96e   :  { %v398_v0 = vsub.f32 %v335_v39, %v1026_v63  ;;  %v717_v39 = vld [vmem:[%s1373_s5 + $0x10] sm:$0xff] }
 0x96f   :  { %993 = vmatpush.msra.mxu3 %v717_v39  ;;  %760 = vmatpush.msra.mxu1 %v717_v39 }
 0x970   :  { %400 = vrot.lane.b32.xlu0 %v398_v0, %s1085_s3  ;;  %v97_v0 = vadd.f32 %v1199_v14, %v96_v61 }
 0x971   :  { %994 = vmatpush.msra.mxu3 %v716_v41  ;;  %761 = vmatpush.msra.mxu1 %v716_v41 }
 0x973   :  { %995 = vmatpush.msra.mxu3 %v715_v42  ;;  %762 = vmatpush.msra.mxu1 %v715_v42 }
 0x9e2   :  { %v401_v1 = vpop.permute.xlu0 %400 }
 0x9e3   :  { %v403_v2 = vmul.f32 %v401_v1, %v384_v59 }
 0x9e5   :  { %405 = vrot.lane.b32.xlu1 %v403_v2, %s1086_s17 }
 0xa57   :  { %v406_v3 = vpop.permute.xlu1 %405 }
 0xa58   :  { %v408_v4 = vadd.f32 %v1026_v63, %v406_v3 }
 0xa5a   :  { %410 = vrot.lane.b32.xlu2 %v408_v4, %s1083_s14 }
 0xab4   :  { %v411_v6 = vpop.permute.xlu2 %410 }
 0xab5   :  { %414 = vst.msk [vmem:[#allocation3 + $0x18] sm:$0xff] %vm121_vm5, %v411_v6  ;;  %967 = vmatmul.msk.f32.vlgmr.msrb.gmra.mxu2 %vm121_vm5, %v411_v6 }
 0xb38   :  { %v436_v7 = vpop.f32.mrf.mxu2 }
 0xb39   :  { %v459_v8 = vadd.f32 %v436_v7, %v1192_v10  ;;  %v439_v13 = vadd.f32 %v436_v7, %v94_v12 }
 0xb3b   :  { %461 = vrot.lane.b32.xlu0 %v459_v8, %s1083_s14  ;;  %v968_v15 = vmul.f32 -1.442695, %v439_v13 }
 0xb3d   :  { %1027 = vpow2.f32 %v968_v15 }
 0xb43   :  { %v1028_v16 = vpop.eup %1027 }
 0xb44   :  { %v443_v17 = vadd.f32 1.0, %v1028_v16 }
 0xb46   :  { %1029 = vrcp.f32 %v443_v17  ;;  %v455_v23 = vand.u32 2147483648, %v443_v17  ;;  %vm449_vm4 = vweird.f32 %v443_v17  ;;  %v453_v24 = vand.u32 2147483647, %v443_v17 }
 0xb48   :  { %v456_v26 = vor.u32 1.1754944e-38, %v455_v23  ;;  %vm454_vm7 = vcmp.eq.f32.partialorder %v453_v24, 8.507059e+37 }
 0xb4c   :  { %v1030_v18 = vpop.eup %1029 }
 0xb4d   :  { %v445_v19 = vmul.f32 %v1030_v18, %v443_v17  ;;  %vm450_vm3 = vweird.f32 %v1030_v18 }
 0xb4e   :  { %vm451_vm6 = vmor %vm449_vm4, %vm450_vm3 }
 0xb4f   :  { %v446_v20 = vsub.f32 1.0, %v445_v19 }
 0xb51   :  { %v447_v21 = vmul.f32 %v1030_v18, %v446_v20 }
 0xb53   :  { %v448_v22 = vadd.f32 %v1030_v18, %v447_v21 }
 0xb55   :  { %v452_v25 = vsel %vm451_vm6, %v1030_v18, %v448_v22 }
 0xb56   :  { %v457_v28 = vsel %vm454_vm7, %v456_v26, %v452_v25  ;;  %v32_v26 = vld [vmem:[%s1369_s0 + $0x30] sm:$0xff] }
 0xb57   :  { %958 = vmatmul.msk.f32.gmra.mxu0 %vm39_vm0, %v32_v26 }
 0xbad   :  { %v462_v27 = vpop.permute.xlu0 %461 }
 0xbae   :  { %v464_v29 = vmul.f32 %v462_v27, %v457_v28 }
 0xbb0   :  { %466 = vrot.lane.b32.xlu1 %v464_v29, %s1083_s14 }
 0xc22   :  { %v467_v30 = vpop.permute.xlu1 %466 }
 0xc23   :  { %v469_v31 = vadd.f32 %v467_v30, %v94_v12  ;;  %v707_v30 = vld [vmem:[#allocation3] sm:$0xff] }
 0xc25   :  { %1031 = vtanh.f32 %v469_v31 }
 0xc2b   :  { %v1032_v32 = vpop.eup %1031 }
 0xc2c   :  { %v471_v33 = vsub.f32 %v408_v4, %v1032_v32 }
 0xc2e   :  { %473 = vrot.lane.b32.xlu2 %v471_v33, %s1085_s3  ;;  %v709_v33 = vld [vmem:[#allocation3 + $0x10] sm:$0xff] }
 0xc88   :  { %v474_v34 = vpop.permute.xlu2 %473 }
 0xc89   :  { %v476_v35 = vmul.f32 %v474_v34, %v457_v28  ;;  %v710_v34 = vld [vmem:[#allocation3 + $0x18] sm:$0xff] }
 0xc8b   :  { %478 = vrot.lane.b32.xlu0 %v476_v35, %s1086_s17 }
 0xcfd   :  { %v479_v36 = vpop.permute.xlu0 %478 }
 0xcfe   :  { %v1261_v37 = vadd.f32 %v1032_v32, %v479_v36  ;;  %v708_v32 = vld [vmem:[#allocation3 + $0x8] sm:$0xff] }
 0xd00   :  { %483 = vrot.lane.b32.xlu1 %v1261_v37, %s1083_s14 }
 0xd72   :  { %v484_v43 = vpop.permute.xlu1 %483 }
 0xd73   :  { %487 = vst.msk [vmem:[#allocation3 + $0x20] sm:$0xff] %vm121_vm5, %v484_v43  ;;  %969 = vmatmul.msk.f32.vlgmr.msrb.gmra.mxu3 %vm121_vm5, %v484_v43 }
 0xd7a   :  { %v711_v44 = vld [vmem:[#allocation3 + $0x20] sm:$0xff] }
 0xd7b   :  { %979 = vmatmul.msk.f32.vlgmr.msra.gmra.mxu3 %vm121_vm5, %v711_v44 }
 0xdf6   :  { %v509_v45 = vpop.f32.mrf.mxu3 }
 0xdf7   :  { %v532_v46 = vadd.f32 %v509_v45, %v1192_v10  ;;  %v512_v1 = vadd.f32 %v509_v45, %v97_v0 }
 0xdf9   :  { %534 = vrot.lane.b32.xlu2 %v532_v46, %s1083_s14  ;;  %v970_v2 = vmul.f32 -1.442695, %v512_v1 }
 0xdfe   :  { %v776_v48 = vpop.f32.mrf.mxu3 }
 0xdff   :  { %v777_v49 = vadd.f32 %v1289_v47, %v776_v48 }
 0xe01   :  { %v987_v50 = vmul.f32 -1.442695, %v777_v49 }
 0xe03   :  { %1033 = vpow2.f32 %v987_v50 }
 0xe09   :  { %v1034_v51 = vpop.eup %1033 }
 0xe0a   :  { %v816_v52 = vadd.f32 1.0, %v1034_v51 }
 0xe0c   :  { %1035 = vrcp.f32 %v816_v52  ;;  %v891_v56 = vand.u32 2147483648, %v816_v52  ;;  %v889_v58 = vand.u32 2147483647, %v816_v52  ;;  %vm885_vm9 = vweird.f32 %v816_v52 }
 0xe0d   :  { %1037 = vpow2.f32 %v970_v2 }
 0xe0e   :  { %v892_v60 = vor.u32 1.1754944e-38, %v891_v56  ;;  %vm890_vm11 = vcmp.eq.f32.partialorder %v889_v58, 8.507059e+37 }
 0xe12   :  { %v1036_v53 = vpop.eup %1035 }
 0xe13   :  { %v881_v54 = vmul.f32 %v1036_v53, %v816_v52  ;;  %vm886_vm8 = vweird.f32 %v1036_v53  ;;  %v1038_v3 = vpop.eup %1037 }
 0xe14   :  { %vm887_vm10 = vmor %vm885_vm9, %vm886_vm8  ;;  %v516_v4 = vadd.f32 1.0, %v1038_v3 }
 0xe15   :  { %v882_v55 = vsub.f32 1.0, %v881_v54 }
 0xe16   :  { %1039 = vrcp.f32 %v516_v4  ;;  %v528_v12 = vand.u32 2147483648, %v516_v4  ;;  %vm522_vm13 = vweird.f32 %v516_v4  ;;  %v526_v13 = vand.u32 2147483647, %v516_v4 }
 0xe17   :  { %v883_v57 = vmul.f32 %v1036_v53, %v882_v55 }
 0xe18   :  { %v529_v16 = vor.u32 1.1754944e-38, %v528_v12  ;;  %vm527_vm15 = vcmp.eq.f32.partialorder %v526_v13, 8.507059e+37 }
 0xe19   :  { %v884_v59 = vadd.f32 %v1036_v53, %v883_v57 }
 0xe1b   :  { %v888_v62 = vsel %vm887_vm10, %v1036_v53, %v884_v59 }
 0xe1c   :  { %v893_v63 = vsel %vm890_vm11, %v892_v60, %v888_v62  ;;  %v1040_v5 = vpop.eup %1039 }
 0xe1d   :  { %944 = vst [vmem:[%s1375_s7 + $0x20] sm:$0xff] %v893_v63  ;;  %v518_v6 = vmul.f32 %v1040_v5, %v516_v4  ;;  %vm523_vm12 = vweird.f32 %v1040_v5 }
 0xe1e   :  { %vm524_vm14 = vmor %vm522_vm13, %vm523_vm12 }
 0xe1f   :  { %v519_v7 = vsub.f32 1.0, %v518_v6 }
 0xe21   :  { %v520_v8 = vmul.f32 %v1040_v5, %v519_v7 }
 0xe23   :  { %v521_v11 = vadd.f32 %v1040_v5, %v520_v8 }
 0xe25   :  { %v525_v15 = vsel %vm524_vm14, %v1040_v5, %v521_v11 }
 0xe26   :  { %v530_v18 = vsel %vm527_vm15, %v529_v16, %v525_v15 }
 0xe53   :  { %v535_v17 = vpop.permute.xlu2 %534 }
 0xe54   :  { %v537_v19 = vmul.f32 %v535_v17, %v530_v18 }
 0xe56   :  { %539 = vrot.lane.b32.xlu0 %v537_v19, %s1083_s14 }
 0xec8   :  { %v540_v20 = vpop.permute.xlu0 %539 }
 0xec9   :  { %v542_v21 = vadd.f32 %v540_v20, %v97_v0 }
 0xecb   :  { %1041 = vtanh.f32 %v542_v21 }
 0xed1   :  { %v1042_v22 = vpop.eup %1041 }
 0xed2   :  { %v544_v23 = vsub.f32 %v1261_v37, %v1042_v22 }
 0xed4   :  { %546 = vrot.lane.b32.xlu1 %v544_v23, %s1085_s3 }
 0xf46   :  { %v547_v24 = vpop.permute.xlu1 %546 }
 0xf47   :  { %v549_v25 = vmul.f32 %v547_v24, %v530_v18 }
 0xf49   :  { %551 = vrot.lane.b32.xlu2 %v549_v25, %s1086_s17 }
 0xfa3   :  { %v552_v27 = vpop.permute.xlu2 %551 }
 0xfa4   :  { %v1304_v28 = vadd.f32 %v1042_v22, %v552_v27 }
 0xfa6   :  { %556 = vrot.lane.b32.xlu0 %v1304_v28, %s1083_s14 }
0x1018   :  { %v557_v29 = vpop.permute.xlu0 %556 }
0x1019   :  { %560 = vst.msk [vmem:[#allocation3 + $0x28] sm:$0xff] %vm121_vm5, %v557_v29  ;;  %971 = vmatmul.msk.f32.vlgmr.msrb.gmra.mxu1 %vm121_vm5, %v557_v29 }
0x1020   :  { %v712_v31 = vld [vmem:[#allocation3 + $0x28] sm:$0xff] }
0x1021   :  { %975 = vmatmul.msk.f32.vlgmr.msra.gmra.mxu1 %vm121_vm5, %v707_v30  ;;  %980 = vmatmul.msk.f32.gmra.mxu3 %vm121_vm5, %v712_v31 }
0x1029   :  { %976 = vmatmul.msk.f32.gmra.mxu1 %vm121_vm5, %v708_v32 }
0x1031   :  { %977 = vmatmul.msk.f32.gmra.mxu1 %vm121_vm5, %v709_v33 }
0x1039   :  { %978 = vmatmul.msk.f32.gmra.mxu1 %vm121_vm5, %v710_v34 }
0x1096   :  { %v1315_v35 = vpop.f32.mrf.mxu1 }
0x1097   :  { %v605_v36 = vadd.f32 %v1315_v35, %v1192_v10 }
0x1099   :  { %607 = vrot.lane.b32.xlu1 %v605_v36, %s1083_s14 }
0x109e   :  { %v764_v37 = vpop.f32.mrf.mxu1 }
0x109f   :  { %v765_v38 = vadd.f32 %v1289_v47, %v764_v37 }
0x10a1   :  { %v983_v39 = vmul.f32 -1.442695, %v765_v38 }
0x10a3   :  { %1043 = vpow2.f32 %v983_v39 }
0x10a4   :  { %v779_v40 = vpop.f32.mrf.mxu3 }
0x10a5   :  { %v780_v41 = vadd.f32 %v1289_v47, %v779_v40 }
0x10a6   :  { %v767_v42 = vpop.f32.mrf.mxu1 }
0x10a7   :  { %v988_v43 = vmul.f32 -1.442695, %v780_v41  ;;  %v768_v44 = vadd.f32 %v1289_v47, %v767_v42 }
0x10a9   :  { %v1044_v45 = vpop.eup %1043  ;;  %1045 = vpow2.f32 %v988_v43  ;;  %v984_v46 = vmul.f32 -1.442695, %v768_v44 }
0x10aa   :  { %v812_v48 = vadd.f32 1.0, %v1044_v45 }
0x10ab   :  { %1047 = vpow2.f32 %v984_v46 }
0x10ac   :  { %1049 = vrcp.f32 %v812_v48  ;;  %v831_v59 = vand.u32 2147483648, %v812_v48  ;;  %v829_v62 = vand.u32 2147483647, %v812_v48  ;;  %vm825_vm1 = vweird.f32 %v812_v48 }
0x10ae   :  { %v770_v49 = vpop.f32.mrf.mxu1  ;;  %v832_v5 = vor.u32 1.1754944e-38, %v831_v59  ;;  %vm830_vm3 = vcmp.eq.f32.partialorder %v829_v62, 8.507059e+37 }
0x10af   :  { %v1046_v50 = vpop.eup %1045  ;;  %v771_v51 = vadd.f32 %v1289_v47, %v770_v49 }
0x10b0   :  { %v817_v52 = vadd.f32 1.0, %v1046_v50 }
0x10b1   :  { %v1048_v53 = vpop.eup %1047  ;;  %v985_v54 = vmul.f32 -1.442695, %v771_v51 }
0x10b2   :  { %v1050_v55 = vpop.eup %1049  ;;  %1051 = vrcp.f32 %v817_v52  ;;  %v813_v57 = vadd.f32 1.0, %v1048_v53  ;;  %v906_v13 = vand.u32 2147483648, %v817_v52  ;;  %v904_v17 = vand.u32 2147483647, %v817_v52  ;;  %v99_v53 = vpop.f32.mrf.mxu0 }
0x10b3   :  { %v821_v56 = vmul.f32 %v1050_v55, %v812_v48  ;;  %1053 = vpow2.f32 %v985_v54  ;;  %vm826_vm0 = vweird.f32 %v1050_v55  ;;  %vm900_vm6 = vweird.f32 %v817_v52 }
0x10b4   :  { %1055 = vrcp.f32 %v813_v57  ;;  %vm827_vm2 = vmor %vm825_vm1, %vm826_vm0  ;;  %v846_v20 = vand.u32 2147483648, %v813_v57  ;;  %v907_v21 = vor.u32 1.1754944e-38, %v906_v13  ;;  %v844_v23 = vand.u32 2147483647, %v813_v57 }
0x10b5   :  { %v822_v58 = vsub.f32 1.0, %v821_v56  ;;  %vm905_vm9 = vcmp.eq.f32.partialorder %v904_v17, 8.507059e+37  ;;  %vm840_vm10 = vweird.f32 %v813_v57  ;;  %v100_v56 = vadd.f32 %v1199_v14, %v99_v53 }
0x10b6   :  { %v773_v60 = vpop.f32.mrf.mxu1  ;;  %v847_v31 = vor.u32 1.1754944e-38, %v846_v20  ;;  %vm845_vm12 = vcmp.eq.f32.partialorder %v844_v23, 8.507059e+37 }
0x10b7   :  { %v823_v61 = vmul.f32 %v1050_v55, %v822_v58  ;;  %v774_v63 = vadd.f32 %v1289_v47, %v773_v60 }
0x10b8   :  { %v1052_v0 = vpop.eup %1051 }
0x10b9   :  { %v1054_v1 = vpop.eup %1053  ;;  %v824_v2 = vadd.f32 %v1050_v55, %v823_v61  ;;  %v896_v3 = vmul.f32 %v1052_v0, %v817_v52  ;;  %v986_v4 = vmul.f32 -1.442695, %v774_v63  ;;  %vm901_vm4 = vweird.f32 %v1052_v0 }
0x10ba   :  { %v814_v6 = vadd.f32 1.0, %v1054_v1  ;;  %v1056_v7 = vpop.eup %1055  ;;  %vm902_vm7 = vmor %vm900_vm6, %vm901_vm4 }
0x10bb   :  { %v828_v8 = vsel %vm827_vm2, %v1050_v55, %v824_v2  ;;  %v897_v11 = vsub.f32 1.0, %v896_v3  ;;  %1057 = vpow2.f32 %v986_v4  ;;  %v836_v15 = vmul.f32 %v1056_v7, %v813_v57 }
0x10bc   :  { %v833_v12 = vsel %vm830_vm3, %v832_v5, %v828_v8  ;;  %1059 = vrcp.f32 %v814_v6  ;;  %vm841_vm8 = vweird.f32 %v1056_v7  ;;  %v861_v37 = vand.u32 2147483648, %v814_v6 }
0x10bd   :  { %940 = vst [vmem:[%s1375_s7] sm:$0xff] %v833_v12  ;;  %v898_v16 = vmul.f32 %v1052_v0, %v897_v11  ;;  %v837_v18 = vsub.f32 1.0, %v836_v15  ;;  %vm842_vm11 = vmor %vm840_vm10, %vm841_vm8  ;;  %v859_v39 = vand.u32 2147483647, %v814_v6  ;;  %vm855_vm14 = vweird.f32 %v814_v6 }
0x10be   :  { %v862_v42 = vor.u32 1.1754944e-38, %v861_v37  ;;  %v585_v57 = vadd.f32 %v1315_v35, %v100_v56 }
0x10bf   :  { %v899_v19 = vadd.f32 %v1052_v0, %v898_v16  ;;  %v838_v22 = vmul.f32 %v1056_v7, %v837_v18  ;;  %vm860_vm0 = vcmp.eq.f32.partialorder %v859_v39, 8.507059e+37 }
0x10c0   :  { %v972_v58 = vmul.f32 -1.442695, %v585_v57 }
0x10c1   :  { %v1058_v24 = vpop.eup %1057  ;;  %v903_v25 = vsel %vm902_vm7, %v1052_v0, %v899_v19  ;;  %v839_v29 = vadd.f32 %v1056_v7, %v838_v22 }
0x10c2   :  { %v1060_v26 = vpop.eup %1059  ;;  %v908_v27 = vsel %vm905_vm9, %v907_v21, %v903_v25  ;;  %v815_v30 = vadd.f32 1.0, %v1058_v24 }
0x10c3   :  { %945 = vst [vmem:[%s1375_s7 + $0x28] sm:$0xff] %v908_v27  ;;  %v851_v32 = vmul.f32 %v1060_v26, %v814_v6  ;;  %v843_v33 = vsel %vm842_vm11, %v1056_v7, %v839_v29  ;;  %vm856_vm13 = vweird.f32 %v1060_v26 }
0x10c4   :  { %1061 = vrcp.f32 %v815_v30  ;;  %v848_v34 = vsel %vm845_vm12, %v847_v31, %v843_v33  ;;  %vm857_vm15 = vmor %vm855_vm14, %vm856_vm13  ;;  %v876_v48 = vand.u32 2147483648, %v815_v30  ;;  %v874_v50 = vand.u32 2147483647, %v815_v30 }
0x10c5   :  { %v852_v36 = vsub.f32 1.0, %v851_v32  ;;  %941 = vst [vmem:[%s1375_s7 + $0x8] sm:$0xff] %v848_v34  ;;  %vm870_vm2 = vweird.f32 %v815_v30  ;;  %1063 = vpow2.f32 %v972_v58 }
0x10c6   :  { %v877_v52 = vor.u32 1.1754944e-38, %v876_v48  ;;  %vm875_vm4 = vcmp.eq.f32.partialorder %v874_v50, 8.507059e+37 }
0x10c7   :  { %v853_v38 = vmul.f32 %v1060_v26, %v852_v36 }
0x10c9   :  { %v854_v40 = vadd.f32 %v1060_v26, %v853_v38  ;;  %v103_v38 = vadd.f32 %v1199_v14, %v1190_v9 }
0x10ca   :  { %v1062_v41 = vpop.eup %1061 }
0x10cb   :  { %v858_v43 = vsel %vm857_vm15, %v1060_v26, %v854_v40  ;;  %v866_v44 = vmul.f32 %v1062_v41, %v815_v30  ;;  %vm871_vm1 = vweird.f32 %v1062_v41  ;;  %v1064_v59 = vpop.eup %1063 }
0x10cc   :  { %v863_v45 = vsel %vm860_vm0, %v862_v42, %v858_v43  ;;  %vm872_vm3 = vmor %vm870_vm2, %vm871_vm1  ;;  %v589_v60 = vadd.f32 1.0, %v1064_v59 }
0x10cd   :  { %942 = vst [vmem:[%s1375_s7 + $0x10] sm:$0xff] %v863_v45  ;;  %v867_v46 = vsub.f32 1.0, %v866_v44 }
0x10ce   :  { %1065 = vrcp.f32 %v589_v60  ;;  %v601_v2 = vand.u32 2147483648, %v589_v60  ;;  %vm595_vm7 = vweird.f32 %v589_v60  ;;  %v599_v3 = vand.u32 2147483647, %v589_v60 }
0x10cf   :  { %v868_v49 = vmul.f32 %v1062_v41, %v867_v46 }
0x10d0   :  { %v602_v5 = vor.u32 1.1754944e-38, %v601_v2  ;;  %vm600_vm9 = vcmp.eq.f32.partialorder %v599_v3, 8.507059e+37 }
0x10d1   :  { %v869_v51 = vadd.f32 %v1062_v41, %v868_v49 }
0x10d3   :  { %v873_v54 = vsel %vm872_vm3, %v1062_v41, %v869_v51 }
0x10d4   :  { %v878_v55 = vsel %vm875_vm4, %v877_v52, %v873_v54  ;;  %v1066_v61 = vpop.eup %1065 }
0x10d5   :  { %943 = vst [vmem:[%s1375_s7 + $0x18] sm:$0xff] %v878_v55  ;;  %v591_v62 = vmul.f32 %v1066_v61, %v589_v60  ;;  %vm596_vm6 = vweird.f32 %v1066_v61 }
0x10d6   :  { %vm597_vm8 = vmor %vm595_vm7, %vm596_vm6 }
0x10d7   :  { %v592_v63 = vsub.f32 1.0, %v591_v62 }
0x10d9   :  { %v593_v0 = vmul.f32 %v1066_v61, %v592_v63 }
0x10db   :  { %v594_v1 = vadd.f32 %v1066_v61, %v593_v0 }
0x10dd   :  { %v598_v4 = vsel %vm597_vm8, %v1066_v61, %v594_v1 }
0x10de   :  { %v603_v35 = vsel %vm600_vm9, %v602_v5, %v598_v4 }
0x110b   :  { %v608_v6 = vpop.permute.xlu1 %607 }
0x110c   :  { %v610_v7 = vmul.f32 %v608_v6, %v603_v35 }
0x110e   :  { %612 = vrot.lane.b32.xlu2 %v610_v7, %s1083_s14 }
0x1168   :  { %v613_v8 = vpop.permute.xlu2 %612 }
0x1169   :  { %v615_v11 = vadd.f32 %v613_v8, %v100_v56 }
0x116b   :  { %1067 = vtanh.f32 %v615_v11 }
0x1171   :  { %v1068_v12 = vpop.eup %1067 }
0x1172   :  { %v617_v13 = vsub.f32 %v1304_v28, %v1068_v12 }
0x1174   :  { %619 = vrot.lane.b32.xlu0 %v617_v13, %s1085_s3 }
0x11e6   :  { %v620_v15 = vpop.permute.xlu0 %619 }
0x11e7   :  { %v622_v16 = vmul.f32 %v620_v15, %v603_v35 }
0x11e9   :  { %624 = vrot.lane.b32.xlu1 %v622_v16, %s1086_s17 }
0x125b   :  { %v625_v17 = vpop.permute.xlu1 %624 }
0x125c   :  { %v627_v18 = vadd.f32 %v1068_v12, %v625_v17 }
0x125e   :  { %629 = vrot.lane.b32.xlu2 %v627_v18, %s1083_s14 }
0x12b8   :  { %v630_v19 = vpop.permute.xlu2 %629 }
0x12b9   :  { %633 = vst.msk [vmem:[#allocation3 + $0x30] sm:$0xff] %vm121_vm5, %v630_v19  ;;  %973 = vmatmul.msk.f32.vlgmr.msra.gmra.mxu2 %vm121_vm5, %v630_v19 }
0x12c0   :  { %v713_v20 = vld [vmem:[#allocation3 + $0x30] sm:$0xff] }
0x12c1   :  { %981 = vmatmul.msk.f32.gmra.mxu3 %vm121_vm5, %v713_v20 }
0x133c   :  { %v655_v21 = vpop.f32.mrf.mxu2 }
0x133d   :  { %v678_v28 = vadd.f32 %v655_v21, %v1192_v10  ;;  %v658_v39 = vadd.f32 %v655_v21, %v103_v38 }
0x133f   :  { %680 = vrot.lane.b32.xlu0 %v678_v28, %s1083_s14  ;;  %v974_v40 = vmul.f32 -1.442695, %v658_v39 }
0x1344   :  { %v782_v22 = vpop.f32.mrf.mxu3 }
0x1345   :  { %v783_v23 = vadd.f32 %v1289_v47, %v782_v22 }
0x1347   :  { %v989_v24 = vmul.f32 -1.442695, %v783_v23 }
0x1349   :  { %1069 = vpow2.f32 %v989_v24 }
0x134f   :  { %v1070_v25 = vpop.eup %1069 }
0x1350   :  { %v818_v26 = vadd.f32 1.0, %v1070_v25 }
0x1352   :  { %1071 = vrcp.f32 %v818_v26  ;;  %v921_v31 = vand.u32 2147483648, %v818_v26  ;;  %v919_v33 = vand.u32 2147483647, %v818_v26  ;;  %vm915_vm11 = vweird.f32 %v818_v26 }
0x1353   :  { %1073 = vpow2.f32 %v974_v40 }
0x1354   :  { %v922_v10 = vor.u32 1.1754944e-38, %v921_v31  ;;  %vm920_vm13 = vcmp.eq.f32.partialorder %v919_v33, 8.507059e+37 }
0x1358   :  { %v1072_v27 = vpop.eup %1071 }
0x1359   :  { %v911_v29 = vmul.f32 %v1072_v27, %v818_v26  ;;  %vm916_vm10 = vweird.f32 %v1072_v27  ;;  %v1074_v41 = vpop.eup %1073 }
0x135a   :  { %vm917_vm12 = vmor %vm915_vm11, %vm916_vm10  ;;  %v662_v42 = vadd.f32 1.0, %v1074_v41 }
0x135b   :  { %v912_v30 = vsub.f32 1.0, %v911_v29 }
0x135c   :  { %1075 = vrcp.f32 %v662_v42  ;;  %v674_v49 = vand.u32 2147483648, %v662_v42  ;;  %vm668_vm15 = vweird.f32 %v662_v42  ;;  %v672_v50 = vand.u32 2147483647, %v662_v42 }
0x135d   :  { %v913_v32 = vmul.f32 %v1072_v27, %v912_v30 }
0x135e   :  { %v675_v52 = vor.u32 1.1754944e-38, %v674_v49  ;;  %vm673_vm1 = vcmp.eq.f32.partialorder %v672_v50, 8.507059e+37 }
0x135f   :  { %v914_v34 = vadd.f32 %v1072_v27, %v913_v32 }
0x1361   :  { %v918_v36 = vsel %vm917_vm12, %v1072_v27, %v914_v34 }
0x1362   :  { %v923_v37 = vsel %vm920_vm13, %v922_v10, %v918_v36  ;;  %v1076_v43 = vpop.eup %1075 }
0x1363   :  { %946 = vst [vmem:[%s1375_s7 + $0x30] sm:$0xff] %v923_v37  ;;  %v664_v44 = vmul.f32 %v1076_v43, %v662_v42  ;;  %vm669_vm14 = vweird.f32 %v1076_v43 }
0x1364   :  { %vm670_vm0 = vmor %vm668_vm15, %vm669_vm14 }
0x1365   :  { %v665_v45 = vsub.f32 1.0, %v664_v44 }
0x1367   :  { %v666_v46 = vmul.f32 %v1076_v43, %v665_v45 }
0x1369   :  { %v667_v48 = vadd.f32 %v1076_v43, %v666_v46 }
0x136b   :  { %v671_v51 = vsel %vm670_vm0, %v1076_v43, %v667_v48 }
0x136c   :  { %v676_v14 = vsel %vm673_vm1, %v675_v52, %v671_v51 }
0x13b1   :  { %v681_v9 = vpop.permute.xlu0 %680 }
0x13b2   :  { %v683_v53 = vmul.f32 %v681_v9, %v676_v14 }
0x13b4   :  { %685 = vrot.lane.b32.xlu1 %v683_v53, %s1083_s14 }
0x1426   :  { %v686_v54 = vpop.permute.xlu1 %685 }
0x1427   :  { %v688_v55 = vadd.f32 %v686_v54, %v103_v38 }
0x1429   :  { %1077 = vtanh.f32 %v688_v55 }
0x142f   :  { %v1078_v56 = vpop.eup %1077 }
0x1430   :  { %v690_v57 = vsub.f32 %v627_v18, %v1078_v56 }
0x1432   :  { %692 = vrot.lane.b32.xlu2 %v690_v57, %s1085_s3 }
0x148c   :  { %v693_v58 = vpop.permute.xlu2 %692 }
0x148d   :  { %v695_v59 = vmul.f32 %v693_v58, %v676_v14 }
0x148f   :  { %697 = vrot.lane.b32.xlu0 %v695_v59, %s1086_s17 }
0x1501   :  { %v698_v60 = vpop.permute.xlu0 %697 }
0x1502   :  { %v700_v61 = vadd.f32 %v1078_v56, %v698_v60 }
0x1504   :  { %702 = vrot.lane.b32.xlu1 %v700_v61, %s1083_s14 }
0x1576   :  { %v703_v62 = vpop.permute.xlu1 %702 }
0x1577   :  { %706 = vst.msk [vmem:[#allocation3 + $0x38] sm:$0xff] %vm121_vm5, %v703_v62 }
0x157e   :  { %v714_v63 = vld [vmem:[#allocation3 + $0x38] sm:$0xff] }
0x157f   :  { %982 = vmatmul.msk.f32.gmra.mxu3 %vm121_vm5, %v714_v63 }
0x1602   :  { %v785_v0 = vpop.f32.mrf.mxu3 }
0x1603   :  { %v786_v1 = vadd.f32 %v1289_v47, %v785_v0 }
0x1605   :  { %v990_v2 = vmul.f32 -1.442695, %v786_v1 }
0x1607   :  { %1079 = vpow2.f32 %v990_v2 }
0x160d   :  { %v1080_v3 = vpop.eup %1079 }
0x160e   :  { %v819_v4 = vadd.f32 1.0, %v1080_v3 }
0x1610   :  { %1081 = vrcp.f32 %v819_v4  ;;  %v936_v7 = vand.u32 2147483648, %v819_v4  ;;  %v934_v11 = vand.u32 2147483647, %v819_v4  ;;  %vm930_vm3 = vweird.f32 %v819_v4 }
0x1612   :  { %v937_v13 = vor.u32 1.1754944e-38, %v936_v7  ;;  %vm935_vm5 = vcmp.eq.f32.partialorder %v934_v11, 8.507059e+37 }
0x1616   :  { %v1082_v5 = vpop.eup %1081 }
0x1617   :  { %v926_v6 = vmul.f32 %v1082_v5, %v819_v4  ;;  %vm931_vm2 = vweird.f32 %v1082_v5 }
0x1618   :  { %vm932_vm4 = vmor %vm930_vm3, %vm931_vm2 }
0x1619   :  { %v927_v35 = vsub.f32 1.0, %v926_v6 }
0x161b   :  { %v928_v8 = vmul.f32 %v1082_v5, %v927_v35 }
0x161d   :  { %v929_v12 = vadd.f32 %v1082_v5, %v928_v8 }
0x161f   :  { %v933_v15 = vsel %vm932_vm4, %v1082_v5, %v929_v12 }
0x1620   :  { %v938_v16 = vsel %vm935_vm5, %v937_v13, %v933_v15 }
0x1621   :  { %947 = vst [vmem:[%s1375_s7 + $0x38] sm:$0xff] %v938_v16 }

</bundles_post_ra>
